<compile_context>
chip_gen: v5e
topology: v5e:2x2
jax: 0.10.0
libtpu: 0.0.40
codegen_flags: <defaults>
</compile_context>

<pallas_src>
import jax
import jax.numpy as jnp
from jax.experimental import pallas as pl
from jax.experimental.pallas import tpu as pltpu


# --------------------------------------------------------------------------- fast path kernel
# Single zero-state step (the module's forward right after reset()): no h0/c0 inputs,
# no recurrent matmul.  Gate layout is [ i | o | g | o ] (the dead f slot duplicates the
# o pre-activation so the quarter-lane roll below is correct for either roll direction).

def _zero_state_step_from_gates(gates, hidden_size):
    """`gates`: (B, 4H) f32 pre-activations in lane-quarter layout [ i | o | g | o ].
    Returns (h1_full, c1_full), each (B, 4H); the true h1 / c1 live in lanes [0, H)."""
    h = hidden_size
    lane = jax.lax.broadcasted_iota(jnp.int32, gates.shape, 1)
    is_g = jnp.logical_and(lane >= 2 * h, lane < 3 * h)
    # Two full-vreg EUP pushes + one VPU select instead of four sub-vreg slices.
    act = jnp.where(is_g, jnp.tanh(gates), jax.nn.sigmoid(gates))
    # act quarters: [ sig(i) | sig(o) | tanh(g) | sig(o) ]
    # Half-period roll aligns tanh(g) under sig(i): lanes [0,H) hold c1 = sig(i)*tanh(g).
    c1_full = act * pltpu.roll(act, shift=2 * h, axis=1)
    # Quarter roll aligns sig(o) under tanh(c1); correct for either rotation direction
    # thanks to the duplicated o slot.
    h1_full = pltpu.roll(act, shift=h, axis=1) * jnp.tanh(c1_full)
    return h1_full, c1_full


def lstm_fc_kernel(x_ref, wih_t_ref, b_ref, wfc_ref, bfc_ref, y_ref):
    """Zero-state fast path: y only.  Shapes (whole arrays in VMEM):
      x: (B, I)   wih_t: (I, 4H)   b: (1, 4H) f32   wfc: (H, OP)   bfc: (1, OP) f32
      y: (B, OP) with OP a multiple of 128 (lane-dense store).
    wfc now has only H rows, so the explicit h1_full[:, :H] slice is load-bearing."""
    hidden_size = b_ref.shape[-1] // 4
    wih = wih_t_ref[...]
    x = x_ref[...].astype(wih.dtype)
    gates = jnp.dot(x, wih, preferred_element_type=jnp.float32) + b_ref[...]
    h1_full, _ = _zero_state_step_from_gates(gates, hidden_size)
    h1 = h1_full[:, :hidden_size]                       # lane-0-aligned slice, ~free
    wfc = wfc_ref[...]
    y_ref[...] = (jnp.dot(h1.astype(wfc.dtype), wfc,
                          preferred_element_type=jnp.float32) + bfc_ref[...])


# --------------------------------------------------------------------------- fused sequence kernel
# General stateful step, iterated over grid=(T,).  Weights use constant index_maps so they
# are DMA'd once and stay VMEM-resident; h/c are carried in VMEM scratch across grid steps.
# Torch gate order [ i | f | g | o ] with plain quarter slices (the roll trick does not
# extend cleanly once the f gate is live).

def lstm_seq_kernel(x_ref, h0_ref, c0_ref, wih_t_ref, whh_t_ref, b_ref,
                    wfc_ref, bfc_ref, y_ref, h_out_ref, c_out_ref, h_scr, c_scr):
    t = pl.program_id(0)
    hidden = whh_t_ref.shape[0]

    @pl.when(t == 0)
    def _init():
        h_scr[...] = h0_ref[...]
        c_scr[...] = c0_ref[...]

    wih = wih_t_ref[...]
    whh = whh_t_ref[...]
    x = x_ref[0].astype(wih.dtype)
    h_prev = h_scr[...]
    gates = (jnp.dot(x, wih, preferred_element_type=jnp.float32)
             + jnp.dot(h_prev.astype(whh.dtype), whh, preferred_element_type=jnp.float32)
             + b_ref[...])
    i = jax.nn.sigmoid(gates[:, 0 * hidden:1 * hidden])
    f = jax.nn.sigmoid(gates[:, 1 * hidden:2 * hidden])
    g = jnp.tanh(gates[:, 2 * hidden:3 * hidden])
    o = jax.nn.sigmoid(gates[:, 3 * hidden:4 * hidden])
    c = f * c_scr[...] + i * g
    h = o * jnp.tanh(c)
    h_scr[...] = h
    c_scr[...] = c

    wfc = wfc_ref[...]
    y_ref[0] = (jnp.dot(h.astype(wfc.dtype), wfc,
                        preferred_element_type=jnp.float32) + bfc_ref[...])

    @pl.when(t == pl.num_programs(0) - 1)
    def _finalize():
        h_out_ref[...] = h
        c_out_ref[...] = c


# --------------------------------------------------------------------------- parameter bake

def prepare_params(params, *, matmul_dtype=jnp.float32, fc_dtype=jnp.float32):
    """One-time parameter bake (do NOT call per forward).

    - Pre-transposes W_ih / W_hh, pre-sums b_ih + b_hh.
    - Fast path: gate blocks re-ordered to [i | o | g | o] (dead f slot = copy of o).
    - wfc is (H, out_pad): only H rows, zero-padded to a 128-lane-dense output width.
    - matmul_dtype=bfloat16 halves the LSTM-weight DMA and is MXU-native on v5e, v6e and
      v7x; fc_dtype stays f32 by default (tiny) to avoid compounding h1-cast error.
    """
    hidden = params["w_hh"].shape[1]
    out_features = params["w_fc"].shape[0]

    w_ih = params["w_ih"].astype(jnp.float32)                      # (4H, I), rows [i|f|g|o]
    w_hh = params["w_hh"].astype(jnp.float32)                      # (4H, H)
    bias = (params["b_ih"] + params["b_hh"]).astype(jnp.float32)   # (4H,)

    def gate_dup_o(a):   # [i | f | g | o] -> [i | o | g | o]
        return jnp.concatenate([a[0 * hidden:1 * hidden],
                                a[3 * hidden:4 * hidden],
                                a[2 * hidden:3 * hidden],
                                a[3 * hidden:4 * hidden]], axis=0)

    out_pad = pl.cdiv(out_features, 128) * 128                     # lane-dense output width
    wfc = jnp.zeros((hidden, out_pad), jnp.float32)
    wfc = wfc.at[:, :out_features].set(params["w_fc"].T.astype(jnp.float32))
    bfc = jnp.zeros((1, out_pad), jnp.float32)
    bfc = bfc.at[0, :out_features].set(params["b_fc"].astype(jnp.float32))

    return {
        # zero-state fast path (roll-trick layout)
        "wih_t_roll": gate_dup_o(w_ih).T.astype(matmul_dtype),      # (I, 4H)
        "bias_roll": gate_dup_o(bias).reshape(1, 4 * hidden),       # (1, 4H) f32
        # stateful / fused-sequence path (torch layout)
        "wih_t": w_ih.T.astype(matmul_dtype),                       # (I, 4H)
        "whh_t": w_hh.T.astype(matmul_dtype),                       # (H, 4H)
        "bias": bias.reshape(1, 4 * hidden),                        # (1, 4H) f32
        # fc (shared by both paths)
        "wfc": wfc.astype(fc_dtype),                                # (H, out_pad)
        "bfc": bfc,                                                 # (1, out_pad) f32
        "hidden_size": int(hidden),
        "out_features": int(out_features),
    }


# --------------------------------------------------------------------------- wrappers
# NOTE: call these under jax.jit (as in __main__) so the [:, :out_features] slices fuse
# with the pallas_call instead of becoming standalone dispatches.

def lstm_net_forward(x, prepared):
    """y = fc(LSTM(x)[0]) for one step with zero initial hidden state.  x: (B, I) f32."""
    batch = x.shape[0]
    out_pad = prepared["wfc"].shape[-1]
    vmem = pl.BlockSpec(memory_space=pltpu.MemorySpace.VMEM)
    y_pad = pl.pallas_call(
        lstm_fc_kernel,
        out_shape=jax.ShapeDtypeStruct((batch, out_pad), jnp.float32),
        in_specs=[vmem] * 5,
        out_specs=vmem,
    )(x, prepared["wih_t_roll"], prepared["bias_roll"], prepared["wfc"], prepared["bfc"])
    return y_pad[:, :prepared["out_features"]]


def _seq_pallas_call(xs, h0, c0, prepared):
    seq_len, batch, in_features = xs.shape
    hidden = prepared["hidden_size"]
    out_pad = prepared["wfc"].shape[-1]
    const2 = lambda t: (0, 0)   # weight / state blocks: DMA'd once, VMEM-resident
    return pl.pallas_call(
        lstm_seq_kernel,
        grid=(seq_len,),
        in_specs=[
            pl.BlockSpec((1, batch, in_features), lambda t: (t, 0, 0)),   # x_t
            pl.BlockSpec((batch, hidden), const2),                        # h0
            pl.BlockSpec((batch, hidden), const2),                        # c0
            pl.BlockSpec(prepared["wih_t"].shape, const2),
            pl.BlockSpec(prepared["whh_t"].shape, const2),
            pl.BlockSpec(prepared["bias"].shape, const2),
            pl.BlockSpec(prepared["wfc"].shape, const2),
            pl.BlockSpec(prepared["bfc"].shape, const2),
        ],
        out_specs=(
            pl.BlockSpec((1, batch, out_pad), lambda t: (t, 0, 0)),       # y_t
            pl.BlockSpec((batch, hidden), const2),                        # final h
            pl.BlockSpec((batch, hidden), const2),                        # final c
        ),
        out_shape=(
            jax.ShapeDtypeStruct((seq_len, batch, out_pad), jnp.float32),
            jax.ShapeDtypeStruct((batch, hidden), jnp.float32),
            jax.ShapeDtypeStruct((batch, hidden), jnp.float32),
        ),
        scratch_shapes=[pltpu.VMEM((batch, hidden), jnp.float32),
                        pltpu.VMEM((batch, hidden), jnp.float32)],
        compiler_params=pltpu.CompilerParams(dimension_semantics=("arbitrary",)),
    )(xs, h0, c0, prepared["wih_t"], prepared["whh_t"], prepared["bias"],
      prepared["wfc"], prepared["bfc"])


def _hidden_or_zeros(hidden, batch, prepared):
    if hidden is None:
        z = jnp.zeros((batch, prepared["hidden_size"]), jnp.float32)
        return z, z
    h0, c0 = hidden
    return h0.astype(jnp.float32), c0.astype(jnp.float32)


def lstm_net_step(x, prepared, hidden=None):
    """One module call with an explicit carried hidden state (PyTorch self.hidden).
    Returns (y, (h1, c1))."""
    h0, c0 = _hidden_or_zeros(hidden, x.shape[0], prepared)
    ys, h1, c1 = _seq_pallas_call(x[None], h0, c0, prepared)
    return ys[0, :, :prepared["out_features"]], (h1, c1)


def lstm_net_forward_seq(xs, prepared, hidden=None):
    """Fused T-step forward: equivalent to T chained module calls carrying self.hidden.
    xs: (T, B, I).  Returns (ys: (T, B, O), (hT, cT)).  Weights are DMA'd once."""
    h0, c0 = _hidden_or_zeros(hidden, xs.shape[1], prepared)
    ys, hT, cT = _seq_pallas_call(xs, h0, c0, prepared)
    return ys[:, :, :prepared["out_features"]], (hT, cT)


# --------------------------------------------------------------------------- init / reference

def init_params(key, inputs, outputs, hidden_size):
    """Deterministic init mirroring PyTorch uniform(-1/sqrt(H), 1/sqrt(H))."""
    ks = jax.random.split(key, 6)
    bound = 1.0 / jnp.sqrt(hidden_size)

    def u(k, shape):
        return jax.random.uniform(k, shape, jnp.float32, -bound, bound)

    return {
        "w_ih": u(ks[0], (4 * hidden_size, inputs)),
        "w_hh": u(ks[1], (4 * hidden_size, hidden_size)),
        "b_ih": u(ks[2], (4 * hidden_size,)),
        "b_hh": u(ks[3], (4 * hidden_size,)),
        "w_fc": u(ks[4], (outputs, hidden_size)),
        "b_fc": u(ks[5], (outputs,)),
    }


def _ref_step(x, params, hidden=None):
    """Plain-JAX reference of one module call (LSTM step + fc)."""
    H = params["w_hh"].shape[1]
    B = x.shape[0]
    if hidden is None:
        h0 = jnp.zeros((B, H), jnp.float32)
        c0 = jnp.zeros((B, H), jnp.float32)
    else:
        h0, c0 = hidden
    gates = (x @ params["w_ih"].T + h0 @ params["w_hh"].T
             + params["b_ih"] + params["b_hh"])
    i = jax.nn.sigmoid(gates[:, 0:H])
    f = jax.nn.sigmoid(gates[:, H:2 * H])
    g = jnp.tanh(gates[:, 2 * H:3 * H])
    o = jax.nn.sigmoid(gates[:, 3 * H:4 * H])
    c1 = f * c0 + i * g
    h1 = o * jnp.tanh(c1)
    y = h1 @ params["w_fc"].T + params["b_fc"]
    return y, (h1, c1)


if __name__ == "__main__":
    INPUTS, OUTPUTS, HIDDEN, BATCH, SEQ = 16, 4, 32, 8, 6

    key = jax.random.PRNGKey(0)
    k_x, k_xs, k_p = jax.random.split(key, 3)
    x = jax.random.normal(k_x, (BATCH, INPUTS), jnp.float32)
    xs = jax.random.normal(k_xs, (SEQ, BATCH, INPUTS), jnp.float32)
    params = init_params(k_p, INPUTS, OUTPUTS, HIDDEN)
    prepared = prepare_params(params)

    # ---- zero-state fast path (module forward right after reset()) ----
    y_ref, hid_ref = _ref_step(x, params, None)
    fwd = jax.jit(lambda v: lstm_net_forward(v, prepared))
    y = jax.block_until_ready(fwd(x))
    assert jnp.allclose(y, y_ref, atol=1e-5, rtol=1e-5), "y mismatch (fast path)"

    # ---- stateful stepping (PyTorch self.hidden carried across two calls) ----
    step = jax.jit(lambda v, hid: lstm_net_step(v, prepared, hid))
    zeros = jnp.zeros((BATCH, HIDDEN), jnp.float32)
    y1, hid1 = step(x, (zeros, zeros))
    y2, hid2 = step(xs[0], hid1)
    y2 = jax.block_until_ready(y2)
    y_ref2, hid_ref2 = _ref_step(xs[0], params, hid_ref)
    assert jnp.allclose(y1, y_ref, atol=1e-4, rtol=1e-4), "y mismatch (step, zero state)"
    assert jnp.allclose(hid1[0], hid_ref[0], atol=1e-4, rtol=1e-4), "h1 mismatch (step)"
    assert jnp.allclose(hid1[1], hid_ref[1], atol=1e-4, rtol=1e-4), "c1 mismatch (step)"
    assert jnp.allclose(y2, y_ref2, atol=1e-4, rtol=1e-4), "y mismatch (step 2, carried hidden)"
    assert jnp.allclose(hid2[0], hid_ref2[0], atol=1e-4, rtol=1e-4), "h2 mismatch (step 2)"
    assert jnp.allclose(hid2[1], hid_ref2[1], atol=1e-4, rtol=1e-4), "c2 mismatch (step 2)"

    # ---- fused multi-step forward (T chained module calls in one pallas_call) ----
    seq_fwd = jax.jit(lambda v: lstm_net_forward_seq(v, prepared))
    ys, (hT, cT) = seq_fwd(xs)
    ys = jax.block_until_ready(ys)
    hid = None
    ys_ref = []
    for t in range(SEQ):
        yt, hid = _ref_step(xs[t], params, hid)
        ys_ref.append(yt)
    ys_ref = jnp.stack(ys_ref)
    assert jnp.allclose(ys, ys_ref, atol=1e-4, rtol=1e-4), "ys mismatch (fused sequence)"
    assert jnp.allclose(hT, hid[0], atol=1e-4, rtol=1e-4), "hT mismatch (fused sequence)"
    assert jnp.allclose(cT, hid[1], atol=1e-4, rtol=1e-4), "cT mismatch (fused sequence)"

    # ---- bf16 LSTM-matmul weights (MXU-native on v5e/v6e/v7x; fc kept f32) ----
    prepared_bf16 = prepare_params(params, matmul_dtype=jnp.bfloat16)
    y_bf16 = jax.block_until_ready(
        jax.jit(lambda v: lstm_net_forward(v, prepared_bf16))(x))
    assert jnp.allclose(y_bf16, y_ref, atol=5e-2), "y mismatch (bf16 weights, fast path)"
    ys_bf16, _ = jax.jit(lambda v: lstm_net_forward_seq(v, prepared_bf16))(xs)
    ys_bf16 = jax.block_until_ready(ys_bf16)
    assert jnp.allclose(ys_bf16, ys_ref, atol=5e-2), "ys mismatch (bf16 weights, fused seq)"

    print("KERNEL_OK")
</pallas_src>

<mosaic_0001>
module attributes {stable_mosaic.version = 11 : i64} {
  func.func @lstm_fc_kernel(%arg0: memref<8x16xf32, #tpu.memory_space<vmem>>, %arg1: memref<16x128xf32, #tpu.memory_space<vmem>>, %arg2: memref<1x128xf32, #tpu.memory_space<vmem>>, %arg3: memref<32x128xf32, #tpu.memory_space<vmem>>, %arg4: memref<1x128xf32, #tpu.memory_space<vmem>>, %arg5: memref<8x128xf32, #tpu.memory_space<vmem>>) attributes {dimension_semantics = [], scalar_prefetch = 0 : i64, scratch_operands = 0 : i64, tpu.core_type = #tpu.core_type<tc>} {
    %c0 = arith.constant 0 : index
    %c0_0 = arith.constant 0 : index
    %0 = vector.load %arg1[%c0, %c0_0] : memref<16x128xf32, #tpu.memory_space<vmem>>, vector<16x128xf32>
    %c0_1 = arith.constant 0 : index
    %c0_2 = arith.constant 0 : index
    %1 = vector.load %arg0[%c0_1, %c0_2] : memref<8x16xf32, #tpu.memory_space<vmem>>, vector<8x16xf32>
    %cst = arith.constant dense<0.000000e+00> : vector<8x128xf32>
    %2 = tpu.matmul %1, %0, %cst {dimension_numbers = #tpu.dot_dimension_numbers<[1], [0], [0], [1], [0, 0, 1, 1], [], []>} : vector<8x16xf32>, vector<16x128xf32>, vector<8x128xf32> -> vector<8x128xf32>
    %c0_3 = arith.constant 0 : index
    %c0_4 = arith.constant 0 : index
    %3 = vector.load %arg2[%c0_3, %c0_4] : memref<1x128xf32, #tpu.memory_space<vmem>>, vector<1x128xf32>
    %4 = vector.broadcast %3 : vector<1x128xf32> to vector<8x128xf32>
    %5 = arith.addf %2, %4 : vector<8x128xf32>
    %6 = tpu.iota {dimensions = array<i32: 1>} : vector<8x128xi32>
    %c64_i32 = arith.constant 64 : i32
    %7 = vector.broadcast %c64_i32 : i32 to vector<8x128xi32>
    %8 = arith.cmpi sge, %6, %7 : vector<8x128xi32>
    %c96_i32 = arith.constant 96 : i32
    %9 = vector.broadcast %c96_i32 : i32 to vector<8x128xi32>
    %10 = arith.cmpi slt, %6, %9 : vector<8x128xi32>
    %11 = arith.andi %8, %10 : vector<8x128xi1>
    %12 = math.tanh %5 : vector<8x128xf32>
    %13 = arith.negf %5 : vector<8x128xf32>
    %14 = math.exp %13 : vector<8x128xf32>
    %cst_5 = arith.constant 1.000000e+00 : f32
    %15 = vector.broadcast %cst_5 : f32 to vector<8x128xf32>
    %16 = arith.addf %15, %14 : vector<8x128xf32>
    %17 = arith.divf %15, %16 : vector<8x128xf32>
    %18 = arith.select %11, %12, %17 : vector<8x128xi1>, vector<8x128xf32>
    %c64_i32_6 = arith.constant 64 : i32
    %19 = tpu.dynamic_rotate %18 by %c64_i32_6 dim 1 : vector<8x128xf32>, i32 -> vector<8x128xf32>
    %20 = arith.mulf %18, %19 : vector<8x128xf32>
    %c32_i32 = arith.constant 32 : i32
    %21 = tpu.dynamic_rotate %18 by %c32_i32 dim 1 : vector<8x128xf32>, i32 -> vector<8x128xf32>
    %22 = math.tanh %20 : vector<8x128xf32>
    %23 = arith.mulf %21, %22 : vector<8x128xf32>
    %24 = vector.extract_strided_slice %23 {offsets = [0, 0], sizes = [8, 32], strides = [1, 1]} : vector<8x128xf32> to vector<8x32xf32>
    %c0_7 = arith.constant 0 : index
    %c0_8 = arith.constant 0 : index
    %25 = vector.load %arg3[%c0_7, %c0_8] : memref<32x128xf32, #tpu.memory_space<vmem>>, vector<32x128xf32>
    %cst_9 = arith.constant dense<0.000000e+00> : vector<8x128xf32>
    %26 = tpu.matmul %24, %25, %cst_9 {dimension_numbers = #tpu.dot_dimension_numbers<[1], [0], [0], [1], [0, 0, 1, 1], [], []>} : vector<8x32xf32>, vector<32x128xf32>, vector<8x128xf32> -> vector<8x128xf32>
    %c0_10 = arith.constant 0 : index
    %c0_11 = arith.constant 0 : index
    %27 = vector.load %arg4[%c0_10, %c0_11] : memref<1x128xf32, #tpu.memory_space<vmem>>, vector<1x128xf32>
    %28 = vector.broadcast %27 : vector<1x128xf32> to vector<8x128xf32>
    %29 = arith.addf %26, %28 : vector<8x128xf32>
    %c0_12 = arith.constant 0 : index
    %c0_13 = arith.constant 0 : index
    %30 = vector.load %arg5[%c0_12, %c0_13] : memref<8x128xf32, #tpu.memory_space<vmem>>, vector<8x128xf32>
    tpu.vector_store %arg5[%c0_12, %c0_13], %29 {strides = array<i32>} : memref<8x128xf32, #tpu.memory_space<vmem>>, vector<8x128xf32>,
    return
  }
}

</mosaic_0001>

<bundles_post_ra>
// kernel: _lambda_.1
= control target key start
LH: loop header
LB: loop body
LE: loop exit
PB: predicated region body
PF: predicated region fallthrough
CT: control target
= control target key end

     0   :  { %10 = vsyncpa [#allocation3], 0  ;;  %s362_s0 = inlined_call_operand.hbm [shape: f32[8,16], index: 0, kind: input, shape index: {}]   ;;  %s363_s1 = inlined_call_operand.hbm [shape: f32[16,128], index: 1, kind: input, shape index: {}]   ;;  %s364_s2 = inlined_call_operand.hbm [shape: f32[1,128], index: 2, kind: input, shape index: {}]   ;;  %s365_s3 = inlined_call_operand.hbm [shape: f32[32,128], index: 3, kind: input, shape index: {}]   ;;  %s366_s4 = inlined_call_operand.vmem [shape: f32[1,128], index: 4, kind: input, shape index: {}]   ;;  %s367_s5 = inlined_call_operand.vmem [shape: f32[8,128], index: 5, kind: output, shape index: {}]  }
   0x1   :  { %11 = vsyncpa [#allocation5], 0  ;;  %s28_s20 = sshll.u32 %s363_s1, 4  ;;  %s29_s20 = int_to_ptr.hbm [resolvable:$true] %s28_s20 }
   0x2   :  { %12 = vsyncpa [#allocation8], 0  ;;  %s306_s21 = smov [#allocation4]   ;;  %s18_s25 = sshll.u32 %s362_s0, 4  ;;  %s19_s25 = int_to_ptr.hbm [resolvable:$true] %s18_s25 }
   0x3   :  { %s30_s22 = sshll.u32 %s306_s21, 4  ;;  %s307_s26 = smov 128   ;;  %s31_s22 = int_to_ptr.vmem [resolvable:$true] %s30_s22 }
   0x4   :  { %s308_s27 = smov 8   ;;  %s309_s28 = smov [#allocation2]  }
   0x5   :  { %36 = dma.hbm_to_vmem [thread:$0]  %s29_s20, 256, %s31_s22, [#allocation5], %s307_s26, %s307_s26, %s308_s27  }
   0x6   :  { %s20_s29 = sshll.u32 %s309_s28, 4  ;;  %s42_s7 = sshll.u32 %s364_s2, 4  ;;  %s21_s29 = int_to_ptr.vmem [resolvable:$true] %s20_s29  ;;  %s43_s7 = int_to_ptr.hbm [resolvable:$true] %s42_s7 }
   0x7   :  { %23 = dma.hbm_to_vmem [thread:$0]  %s19_s25, 128, %s21_s29, [#allocation3]  }
   0x8   :  { %s52_s9 = sshll.u32 %s365_s3, 4  ;;  %s310_s10 = smov [#allocation6]   ;;  %s53_s9 = int_to_ptr.hbm [resolvable:$true] %s52_s9 }
   0x9   :  { %s44_s11 = sshll.u32 %s310_s10, 4  ;;  %s311_s0 = smov [#allocation7]   ;;  %s45_s11 = int_to_ptr.vmem [resolvable:$true] %s44_s11 }
   0xa   :  { %47 = dma.hbm_to_vmem [thread:$0]  %s43_s7, 16, %s45_s11, [#allocation5]  }
   0xb   :  { %s54_s12 = sshll.u32 %s311_s0, 4  ;;  %s55_s12 = int_to_ptr.vmem [resolvable:$true] %s54_s12 }
   0xc   :  { %60 = dma.hbm_to_vmem [thread:$0]  %s53_s9, 512, %s55_s12, [#allocation8], %s307_s26, %s307_s26, %s308_s27  }
   0xd   :  { %300 = dma.done.wait [#allocation3], 128  }
   0xe   :  { %301 = vsyncadd [#allocation3], 4294967168 }
   0xf   :  { %302 = dma.done.wait [#allocation5], 272  }
  0x10   :  { %303 = vsyncadd [#allocation5], 4294967024 }
  0x11   :  { %304 = dma.done.wait [#allocation8], 512  }
  0x12   :  { %305 = vsyncadd [#allocation8], 4294966784  ;;  %v80_v0 = vld [vmem:[#allocation4 + $0x8] sm:$0xff]  ;;  %v79_v1 = vld [vmem:[#allocation4] sm:$0xff]  ;;  %vm86_vm0 = vcmask 130048   ;;  %v110_v9 = vlaneseq  ;;  %s312_s2 = smov 64  }
  0x13   :  { %104 = vmatpush.msra.mxu0 %v80_v0  ;;  %v81_v2 = vld [vmem:[#allocation2] sm:$0xff]  ;;  %v194_v3 = vld [vmem:[#allocation6] ss:$0 sm:$0xff]  ;;  %s313_s3 = smov 32   ;;  %v145_v24 = vld [vmem:[#allocation7 + $0x10] sm:$0xff]  ;;  %vm151_vm8 = vcmask 261120  }
  0x14   :  { %v111_v11 = vand.u32 127, %v110_v9  ;;  %v146_v23 = vld [vmem:[#allocation7 + $0x18] sm:$0xff]  ;;  %v144_v25 = vld [vmem:[#allocation7 + $0x8] sm:$0xff]  ;;  %v143_v26 = vld [vmem:[#allocation7] sm:$0xff] }
  0x15   :  { %105 = vmatpush.msra.mxu0 %v79_v1  ;;  %167 = vmatpush.msra.mxu1 %v146_v23  ;;  %v195_v32 = vld [vmem:[%s366_s4] ss:$0 sm:$0xff] }
  0x16   :  { %183 = vmatmul.msk.f32.vlgmr.msra.gmra.mxu0 %vm86_vm0, %v81_v2  ;;  %vm112_vm1 = vcmp.ge.s32.totalorder %v111_v11, 64  ;;  %vm113_vm2 = vcmp.lt.s32.totalorder %v111_v11, 96 }
  0x17   :  { %vm114_vm4 = vmand %vm112_vm1, %vm113_vm2  ;;  %168 = vmatpush.msra.mxu1 %v145_v24 }
  0x19   :  { %169 = vmatpush.msra.mxu1 %v144_v25 }
  0x1b   :  { %170 = vmatpush.msra.mxu1 %v143_v26 }
  0x93   :  { %v107_v4 = vpop.f32.mrf.mxu0 }
  0x94   :  { %v108_v5 = vadd.f32 %v194_v3, %v107_v4 }
  0x96   :  { %v184_v6 = vmul.f32 -1.442695, %v108_v5 }
  0x98   :  { %196 = vpow2.f32 %v184_v6 }
  0x9e   :  { %v197_v7 = vpop.eup %196 }
  0x9f   :  { %v119_v8 = vadd.f32 1.0, %v197_v7 }
  0xa1   :  { %198 = vrcp.f32 %v119_v8  ;;  %v131_v14 = vand.u32 2147483648, %v119_v8  ;;  %v129_v16 = vand.u32 2147483647, %v119_v8  ;;  %vm125_vm5 = vweird.f32 %v119_v8 }
  0xa2   :  { %200 = vtanh.f32 %v108_v5 }
  0xa3   :  { %v132_v18 = vor.u32 1.1754944e-38, %v131_v14  ;;  %vm130_vm7 = vcmp.eq.f32.partialorder %v129_v16, 8.507059e+37 }
  0xa7   :  { %v199_v10 = vpop.eup %198 }
  0xa8   :  { %v121_v12 = vmul.f32 %v199_v10, %v119_v8  ;;  %vm126_vm3 = vweird.f32 %v199_v10  ;;  %v201_v20 = vpop.eup %200 }
  0xa9   :  { %vm127_vm6 = vmor %vm125_vm5, %vm126_vm3 }
  0xaa   :  { %v122_v13 = vsub.f32 1.0, %v121_v12 }
  0xac   :  { %v123_v15 = vmul.f32 %v199_v10, %v122_v13 }
  0xae   :  { %v124_v17 = vadd.f32 %v199_v10, %v123_v15 }
  0xb0   :  { %v128_v19 = vsel %vm127_vm6, %v199_v10, %v124_v17 }
  0xb1   :  { %v133_v21 = vsel %vm130_vm7, %v132_v18, %v128_v19 }
  0xb2   :  { %v135_v22 = vsel %vm114_vm4, %v201_v20, %v133_v21 }
  0xb3   :  { %136 = vrot.lane.b32.xlu0 %v135_v22, %s312_s2 }
  0xbb   :  { %139 = vrot.lane.b32.xlu0 %v135_v22, %s313_s3 }
 0x125   :  { %v137_v27 = vpop.permute.xlu0 %136 }
 0x126   :  { %v138_v28 = vmul.f32 %v137_v27, %v135_v22 }
 0x128   :  { %202 = vtanh.f32 %v138_v28 }
 0x12d   :  { %v140_v29 = vpop.permute.xlu0 %139 }
 0x12e   :  { %v203_v30 = vpop.eup %202 }
 0x12f   :  { %v142_v31 = vmul.f32 %v203_v30, %v140_v29 }
 0x131   :  { %185 = vmatmul.msk.f32.vlgmr.msra.gmra.mxu1 %vm151_vm8, %v142_v31 }
 0x1ae   :  { %v172_v33 = vpop.f32.mrf.mxu1 }
 0x1af   :  { %v173_v34 = vadd.f32 %v195_v32, %v172_v33 }
 0x1b1   :  { %175 = vst [vmem:[%s367_s5] sm:$0xff] %v173_v34 }
 0x1b2   :  { %180 = vsyncpa [#allocation3], 1 }
 0x1b3   :  { %181 = vsyncpa [#allocation5], 1 }
 0x1b4   :  { %182 = vsyncpa [#allocation8], 1 }

</bundles_post_ra>
